<compile_context>
chip_gen: v7x
topology: tpu7x:2x2x1
jax: 0.10.0
libtpu: 0.0.40
codegen_flags: <defaults>
</compile_context>

<pallas_src>
import jax
import jax.numpy as jnp
from jax.experimental import pallas as pl
from jax.experimental.pallas import tpu as pltpu


def _round_up(x, m):
    return ((x + m - 1) // m) * m


# ---------------------------------------------------------------------------
# Kernel: one fused row-tile of  sigmoid(relu(x @ W1 + b1) @ W2 + b2)
# ---------------------------------------------------------------------------
def _frame_stack_kernel(x_ref, w1_ref, b1_ref, w2_ref, b2_ref, o_ref):
    # x_ref : (bm, fold*n_bins)          streamed in the caller's dtype
    # w1_ref: (fold*n_bins, fold*model)  VMEM-resident block-diagonal linear1 weight
    # b1_ref: (1, fold*model)            f32
    # w2_ref: (fold*model, fold*out)     VMEM-resident block-diagonal linear2 weight
    # b2_ref: (1, fold*out)              f32
    # o_ref : (bm, fold*out)             lane-dense output tile
    x = x_ref[...].astype(w1_ref.dtype)  # in-kernel cast: no extra wrapper HBM pass
    # MXU matmuls accumulate in f32; bias/ReLU/sigmoid stay in f32 (no bf16 VPU/EUP on v5e).
    h = jnp.dot(x, w1_ref[...], preferred_element_type=jnp.float32) + b1_ref[...]
    h = jnp.maximum(h, 0.0)                                   # ReLU
    h = h.astype(w2_ref.dtype)                                # back to compute dtype for MXU
    y = jnp.dot(h, w2_ref[...], preferred_element_type=jnp.float32) + b2_ref[...]
    o_ref[...] = jax.nn.sigmoid(y).astype(o_ref.dtype)        # Sigmoid


# ---------------------------------------------------------------------------
# One-time parameter preparation (hoist out of the serving loop)
# ---------------------------------------------------------------------------
def choose_fold(n_bins, model_size, out_features, compute_dtype=jnp.bfloat16,
                max_weight_bytes=8 * 1024 * 1024):
    """How many logical rows to pack per physical row for lane-dense stores.

    fold = 128 // out_features makes every output store a full >=128-lane vst instead of a
    masked 16-lane vst.msk.  The block-diagonal folded weights grow as fold^2 and Pallas
    still double-buffers them even with constant index_maps, so cap fold such that the
    folded W1+W2 stay a few MiB -- this keeps v7x's 64 MiB physical VMEM safe at large
    model sizes.  On v5e, the dense block-diagonal matmul does fold x the useful MXU FLOPs;
    if a trace shows the MXU as the binding slot there, pass fold=4 to
    prepare_frame_stack_params explicitly.
    """
    if out_features >= 128 or 128 % out_features != 0:
        return 1
    fold = 128 // out_features
    cb = jnp.dtype(compute_dtype).itemsize
    weight_elems = n_bins * model_size + model_size * out_features
    while fold > 1 and fold * fold * weight_elems * cb > max_weight_bytes:
        fold //= 2
    return fold


def prepare_frame_stack_params(w1, b1, w2, b2, *, compute_dtype=jnp.bfloat16, fold=None):
    """Build folded, transposed, casted params ONCE per model (not per forward call).

    jnp.kron rebuilds fold^2-sized weights plus casts; doing it per forward is an extra
    HBM pass + host launch work, so hold on to the returned tuple and reuse it.
    Returns (w1f, b1f, w2f, b2f, fold).
    """
    model_size, n_bins = w1.shape
    out_features = w2.shape[0]
    if fold is None:
        fold = choose_fold(n_bins, model_size, out_features, compute_dtype)
    w1t = w1.T                              # (n_bins, model)
    w2t = w2.T                              # (model, out)
    if fold > 1:
        eye = jnp.eye(fold, dtype=w1t.dtype)
        w1t = jnp.kron(eye, w1t)            # (fold*n_bins, fold*model), block-diagonal
        w2t = jnp.kron(eye, w2t)            # (fold*model, fold*out),   block-diagonal
        b1 = jnp.tile(b1, fold)
        b2 = jnp.tile(b2, fold)
    return (w1t.astype(compute_dtype),
            b1.reshape(1, -1).astype(jnp.float32),
            w2t.astype(compute_dtype),
            b2.reshape(1, -1).astype(jnp.float32),
            fold)


# ---------------------------------------------------------------------------
# Forward wrapper
# ---------------------------------------------------------------------------
def frame_stack_forward(x, prepared, *, block_rows=None, out_dtype=None):
    """Frame_Stack forward: sigmoid(linear2(relu(linear1(x)))).

    x        : (..., N_BINS), any float dtype (streamed as-is, cast in-kernel).
    prepared : tuple from prepare_frame_stack_params (reuse across calls!).
    out_dtype: defaults to x.dtype for drop-in semantics; pass jnp.bfloat16 when the
               consumer tolerates it -- it halves output HBM traffic on this mem-bound
               kernel (output error from the bf16 path is ~5e-2 absolute).
    """
    w1f, b1f, w2f, b2f, fold = prepared
    kn, km = w1f.shape
    ko = w2f.shape[1]
    n_bins = kn // fold
    out_features = ko // fold
    assert x.shape[-1] == n_bins, "x last dim must equal N_BINS"
    if out_dtype is None:
        out_dtype = x.dtype
    compute_dtype = w1f.dtype

    lead_shape = x.shape[:-1]
    M = 1
    for d in lead_shape:
        M *= d
    rows_f = pl.cdiv(M, fold)                          # folded rows of real data

    xb = jnp.dtype(x.dtype).itemsize
    ob = jnp.dtype(out_dtype).itemsize
    cb = jnp.dtype(compute_dtype).itemsize

    def footprint(br):
        # Double-buffered x/out streams + weights (Pallas double-buffers them too even
        # with constant index_maps) + resident f32 biases.
        return (2 * br * kn * xb + 2 * br * ko * ob
                + 2 * (kn * km + km * ko) * cb + 2 * (km + ko) * 4)

    # Tile choice: go big (HBM-bound), keep >=4 grid steps for v7x's two TensorCores,
    # stay well under v7x's 64 MiB physical VMEM.
    if block_rows is None:
        block_rows = min(1024, _round_up(pl.cdiv(rows_f, 4), 16))
    block_rows = max(16, _round_up(block_rows, 16))    # sublane-safe for bf16 and f32
    while block_rows > 16 and footprint(block_rows) > 36 * 1024 * 1024:
        block_rows = max(16, _round_up(block_rows // 2, 16))

    # Padding policy: only pad what the fold-reshape needs.  For the common case
    # (M % fold == 0 and at least one full block of rows) there is NO wrapper-side copy
    # of x; the block-granularity remainder is handled by Pallas' partial last block
    # (bounded input DMA + masked output store), and padded/garbage rows are sliced off.
    rows_arr = block_rows if rows_f < block_rows else rows_f
    m_arr = rows_arr * fold
    x2d = x.reshape(M, n_bins)
    if m_arr > M:
        x2d = jnp.pad(x2d, ((0, m_arr - M), (0, 0)))
    xf = x2d.reshape(rows_arr, kn)
    grid = pl.cdiv(rows_arr, block_rows)

    vmem_limit = int(min(48 * 1024 * 1024,
                         max(16 * 1024 * 1024, 2 * footprint(block_rows))))

    outf = pl.pallas_call(
        _frame_stack_kernel,
        out_shape=jax.ShapeDtypeStruct((rows_arr, ko), out_dtype),
        grid_spec=pltpu.PrefetchScalarGridSpec(
            num_scalar_prefetch=0,
            grid=(grid,),
            in_specs=[
                pl.BlockSpec((block_rows, kn), lambda i: (i, 0)),
                # Constant index_maps keep weights/biases VMEM-resident (no per-step DMA).
                # They are still double-buffered by the pipeline; choose_fold caps their
                # size instead of relying on single-buffering them.
                pl.BlockSpec((kn, km), lambda i: (0, 0)),
                pl.BlockSpec((1, km), lambda i: (0, 0)),
                pl.BlockSpec((km, ko), lambda i: (0, 0)),
                pl.BlockSpec((1, ko), lambda i: (0, 0)),
            ],
            out_specs=pl.BlockSpec((block_rows, ko), lambda i: (i, 0)),
        ),
        compiler_params=pltpu.CompilerParams(
            dimension_semantics=("parallel",),   # independent row tiles -> v7x megacore split
            vmem_limit_bytes=vmem_limit,
        ),
    )(xf, w1f, b1f, w2f, b2f)

    # Unfold back to (M, out_features); padded/garbage rows dropped by the [:M] slice.
    out2d = outf.reshape(rows_arr * fold, out_features)[:M]
    return out2d.reshape(*lead_shape, out_features)


def init_frame_stack_params(key, n_bins, model_size, output_features):
    """Deterministic synthetic init mirroring nn.Linear shapes (layers=2)."""
    k1, k2, k3, k4 = jax.random.split(key, 4)
    bound1 = 1.0 / jnp.sqrt(n_bins)
    bound2 = 1.0 / jnp.sqrt(model_size)
    w1 = jax.random.uniform(k1, (model_size, n_bins), jnp.float32, -bound1, bound1)
    b1 = jax.random.uniform(k2, (model_size,), jnp.float32, -bound1, bound1)
    w2 = jax.random.uniform(k3, (output_features, model_size), jnp.float32, -bound2, bound2)
    b2 = jax.random.uniform(k4, (output_features,), jnp.float32, -bound2, bound2)
    return w1, b1, w2, b2


if __name__ == "__main__":
    # Small shapes consistent with the module's forward: (batch, seq, N_BINS).
    N_BINS = 32
    MODEL_SIZE = 32
    OUTPUT_FEATURES = 16
    BATCH, SEQ = 2, 8

    key = jax.random.PRNGKey(0)
    kx, kp = jax.random.split(key)
    x = jax.random.normal(kx, (BATCH, SEQ, N_BINS), dtype=jnp.float32)
    w1, b1, w2, b2 = init_frame_stack_params(kp, N_BINS, MODEL_SIZE, OUTPUT_FEATURES)

    # Pure-JAX reference (same math as the PyTorch module, layers=2).
    ref = jax.nn.sigmoid(jnp.maximum(x @ w1.T + b1, 0.0) @ w2.T + b2)

    # Prepare params ONCE per (model, compute_dtype) and reuse across forward calls.
    prepared_f32 = prepare_frame_stack_params(w1, b1, w2, b2, compute_dtype=jnp.float32)
    prepared_bf16 = prepare_frame_stack_params(w1, b1, w2, b2, compute_dtype=jnp.bfloat16)

    # 1) f32 compute path: numerics match the reference (block-diag zeros are exact).
    out_f32 = jax.block_until_ready(frame_stack_forward(x, prepared_f32))
    assert out_f32.shape == (BATCH, SEQ, OUTPUT_FEATURES)
    assert jnp.allclose(out_f32, ref, atol=1e-5, rtol=1e-5)

    # 2) Recommended fast path: bf16 streaming weights + bf16 output (halves output HBM
    #    traffic), f32 MXU accumulation; x streams in f32 and is cast inside the kernel.
    out_bf16 = jax.block_until_ready(
        frame_stack_forward(x, prepared_bf16, out_dtype=jnp.bfloat16))
    assert out_bf16.shape == (BATCH, SEQ, OUTPUT_FEATURES)
    assert jnp.allclose(out_bf16.astype(jnp.float32), ref, atol=5e-2)

    print("KERNEL_OK")
</pallas_src>

<mosaic_0001>
module attributes {stable_mosaic.version = 11 : i64} {
  func.func @_frame_stack_kernel(%arg0: i32, %arg1: memref<16x256xf32, #tpu.memory_space<vmem>>, %arg2: memref<256x256xf32, #tpu.memory_space<vmem>>, %arg3: memref<1x256xf32, #tpu.memory_space<vmem>>, %arg4: memref<256x128xf32, #tpu.memory_space<vmem>>, %arg5: memref<1x128xf32, #tpu.memory_space<vmem>>, %arg6: memref<16x128xf32, #tpu.memory_space<vmem>>) attributes {dimension_semantics = [#tpu.dimension_semantics<parallel>], iteration_bounds = array<i64: 1>, scalar_prefetch = 0 : i64, scratch_operands = 0 : i64, tpu.core_type = #tpu.core_type<tc>, window_params = [{transform_indices = @transform_0, window_bounds = array<i64: 16, 256>}, {pipeline_mode = #tpu.pipeline_mode<synchronous>, transform_indices = @transform_1, window_bounds = array<i64: 256, 256>}, {pipeline_mode = #tpu.pipeline_mode<synchronous>, transform_indices = @transform_2, window_bounds = array<i64: 1, 256>}, {pipeline_mode = #tpu.pipeline_mode<synchronous>, transform_indices = @transform_3, window_bounds = array<i64: 256, 128>}, {pipeline_mode = #tpu.pipeline_mode<synchronous>, transform_indices = @transform_4, window_bounds = array<i64: 1, 128>}, {transform_indices = @transform_5, window_bounds = array<i64: 16, 128>}]} {
    %c0 = arith.constant 0 : index
    %c0_0 = arith.constant 0 : index
    %0 = vector.load %arg1[%c0, %c0_0] : memref<16x256xf32, #tpu.memory_space<vmem>>, vector<16x256xf32>
    %c0_1 = arith.constant 0 : index
    %c0_2 = arith.constant 0 : index
    %1 = vector.load %arg2[%c0_1, %c0_2] : memref<256x256xf32, #tpu.memory_space<vmem>>, vector<256x256xf32>
    %cst = arith.constant dense<0.000000e+00> : vector<16x256xf32>
    %2 = tpu.matmul %0, %1, %cst {dimension_numbers = #tpu.dot_dimension_numbers<[1], [0], [0], [1], [0, 0, 1, 1], [], []>} : vector<16x256xf32>, vector<256x256xf32>, vector<16x256xf32> -> vector<16x256xf32>
    %c0_3 = arith.constant 0 : index
    %c0_4 = arith.constant 0 : index
    %3 = vector.load %arg3[%c0_3, %c0_4] : memref<1x256xf32, #tpu.memory_space<vmem>>, vector<1x256xf32>
    %4 = vector.broadcast %3 : vector<1x256xf32> to vector<16x256xf32>
    %5 = arith.addf %2, %4 : vector<16x256xf32>
    %cst_5 = arith.constant 0.000000e+00 : f32
    %6 = vector.broadcast %cst_5 : f32 to vector<16x256xf32>
    %7 = arith.maximumf %5, %6 : vector<16x256xf32>
    %c0_6 = arith.constant 0 : index
    %c0_7 = arith.constant 0 : index
    %8 = vector.load %arg4[%c0_6, %c0_7] : memref<256x128xf32, #tpu.memory_space<vmem>>, vector<256x128xf32>
    %cst_8 = arith.constant dense<0.000000e+00> : vector<16x128xf32>
    %9 = tpu.matmul %7, %8, %cst_8 {dimension_numbers = #tpu.dot_dimension_numbers<[1], [0], [0], [1], [0, 0, 1, 1], [], []>} : vector<16x256xf32>, vector<256x128xf32>, vector<16x128xf32> -> vector<16x128xf32>
    %c0_9 = arith.constant 0 : index
    %c0_10 = arith.constant 0 : index
    %10 = vector.load %arg5[%c0_9, %c0_10] : memref<1x128xf32, #tpu.memory_space<vmem>>, vector<1x128xf32>
    %11 = vector.broadcast %10 : vector<1x128xf32> to vector<16x128xf32>
    %12 = arith.addf %9, %11 : vector<16x128xf32>
    %13 = arith.negf %12 : vector<16x128xf32>
    %14 = math.exp %13 : vector<16x128xf32>
    %cst_11 = arith.constant 1.000000e+00 : f32
    %15 = vector.broadcast %cst_11 : f32 to vector<16x128xf32>
    %16 = arith.addf %15, %14 : vector<16x128xf32>
    %17 = arith.divf %15, %16 : vector<16x128xf32>
    %c0_12 = arith.constant 0 : index
    %c0_13 = arith.constant 0 : index
    %18 = vector.load %arg6[%c0_12, %c0_13] : memref<16x128xf32, #tpu.memory_space<vmem>>, vector<16x128xf32>
    tpu.vector_store %arg6[%c0_12, %c0_13], %17 {strides = array<i32>} : memref<16x128xf32, #tpu.memory_space<vmem>>, vector<16x128xf32>,
    return
  }
  func.func @transform_0(%arg0: i32) -> (i32, i32) {
    %c0_i32 = arith.constant 0 : i32
    %c0_i32_0 = arith.constant 0 : i32
    return %arg0, %c0_i32 : i32, i32
  }
  func.func @transform_1(%arg0: i32) -> (i32, i32) {
    %c0_i32 = arith.constant 0 : i32
    %c0_i32_0 = arith.constant 0 : i32
    %c0_i32_1 = arith.constant 0 : i32
    return %c0_i32, %c0_i32_0 : i32, i32
  }
  func.func @transform_2(%arg0: i32) -> (i32, i32) {
    %c0_i32 = arith.constant 0 : i32
    %c0_i32_0 = arith.constant 0 : i32
    %c0_i32_1 = arith.constant 0 : i32
    return %c0_i32, %c0_i32_0 : i32, i32
  }
  func.func @transform_3(%arg0: i32) -> (i32, i32) {
    %c0_i32 = arith.constant 0 : i32
    %c0_i32_0 = arith.constant 0 : i32
    %c0_i32_1 = arith.constant 0 : i32
    return %c0_i32, %c0_i32_0 : i32, i32
  }
  func.func @transform_4(%arg0: i32) -> (i32, i32) {
    %c0_i32 = arith.constant 0 : i32
    %c0_i32_0 = arith.constant 0 : i32
    %c0_i32_1 = arith.constant 0 : i32
    return %c0_i32, %c0_i32_0 : i32, i32
  }
  func.func @transform_5(%arg0: i32) -> (i32, i32) {
    %c0_i32 = arith.constant 0 : i32
    %c0_i32_0 = arith.constant 0 : i32
    return %arg0, %c0_i32 : i32, i32
  }
}

</mosaic_0001>

<bundles_post_ra>
// kernel: tpu_custom_call.1
= control target key start
LH: loop header
LB: loop body
LE: loop exit
PB: predicated region body
PF: predicated region fallthrough
CT: control target
= control target key end

     0   :  { %10 = vsyncpa [#allocation3], 0  ;;  %s721_s0 = inlined_call_operand.hbm [shape: f32[16,256], index: 0, kind: input, shape index: {}]   ;;  %s722_s1 = inlined_call_operand.hbm [shape: f32[256,256], index: 1, kind: input, shape index: {}]   ;;  %s723_s2 = inlined_call_operand.vmem [shape: f32[1,256], index: 2, kind: input, shape index: {}]   ;;  %s724_s3 = inlined_call_operand.hbm [shape: f32[256,128], index: 3, kind: input, shape index: {}]   ;;  %s725_s4 = inlined_call_operand.vmem [shape: f32[1,128], index: 4, kind: input, shape index: {}]   ;;  %s726_s5 = inlined_call_operand.hbm [shape: f32[16,128], index: 5, kind: output, shape index: {}]  }
   0x1   :  { %11 = vsyncpa [#allocation6], 0 }
   0x2   :  { %12 = vsyncpa [#allocation4], 0  ;;  %s616_s18 = smov [#allocation5]   ;;  %s617_s20 = smov [#allocation2]  }
   0x3   :  { %s30_s19 = sshll.u32 %s616_s18, 4  ;;  %s18_s21 = sshll.u32 %s617_s20, 4  ;;  %s31_s19 = int_to_ptr.vmem [resolvable:$true] %s30_s19  ;;  %s654_s21 = int_to_ptr.vmem [resolvable:$true] %s18_s21 }
   0x4   :  { %s522_s24 = scalar_lea.hbm %s722_s1, 8192 }
   0x5   :  { %p523_p0 = scmp.ne.s32.totalorder %s722_s1, %s522_s24  ;;  %p526_p1 = scmp.lt.u32.totalorder %s522_s24, %s722_s1 }
   0x7   :  { %p528_p2 = pnand %p526_p1, %p523_p0 }
   0x9   :  { %531 = shalt.err (!%p528_p2)
}
   0xa   :  { %s532_s29 = scalar_lea.vmem %s31_s19, 8192  ;;  %p537_p4 = scmp.lt.s32.totalorder %s31_s19, %s31_s19 }
   0xb   :  { %p533_p3 = scmp.ne.s32.totalorder %s31_s19, %s532_s29  ;;  %p538_p5 = scmp.lt.s32.totalorder %s532_s29, %s532_s29 }
   0xd   :  { %p539_p6 = por %p538_p5, %p537_p4 }
   0xf   :  { %p540_p7 = pnand %p539_p6, %p533_p3 }
  0x11   :  { %543 = shalt.err (!%p540_p7)
}
  0x12   :  { %s618_s30 = smov 256   ;;  %s619_s6 = smov 16  }
  0x13   :  { %36 = dma.hbm_to_vmem [thread:$0]  %s722_s1, 8192, %s31_s19, [#allocation6], %s618_s30, %s618_s30, %s619_s6  }
  0x14   :  { %s544_s11 = scalar_lea.hbm %s721_s0, 512 }
  0x15   :  { %p545_p8 = scmp.ne.s32.totalorder %s721_s0, %s544_s11  ;;  %p548_p9 = scmp.lt.u32.totalorder %s544_s11, %s721_s0 }
  0x17   :  { %p550_p10 = pnand %p548_p9, %p545_p8 }
  0x19   :  { %553 = shalt.err (!%p550_p10)
}
  0x1a   :  { %s554_s16 = scalar_lea.vmem %s654_s21, 512  ;;  %p559_p12 = scmp.lt.s32.totalorder %s654_s21, %s654_s21 }
  0x1b   :  { %p555_p11 = scmp.ne.s32.totalorder %s654_s21, %s554_s16  ;;  %p560_p13 = scmp.lt.s32.totalorder %s554_s16, %s554_s16 }
  0x1d   :  { %p561_p0 = por %p560_p13, %p559_p12 }
  0x1f   :  { %p562_p1 = pnand %p561_p0, %p555_p11 }
  0x21   :  { %565 = shalt.err (!%p562_p1)
}
  0x22   :  { %24 = dma.hbm_to_vmem [thread:$0]  %s721_s0, 512, %s654_s21, [#allocation3], %s618_s30, %s618_s30, %s619_s6  }
  0x23   :  { %s620_s18 = smov [#allocation7]   ;;  %s566_s23 = scalar_lea.hbm %s724_s3, 4096 }
  0x24   :  { %s44_s19 = sshll.u32 %s620_s18, 4  ;;  %p567_p2 = scmp.ne.s32.totalorder %s724_s3, %s566_s23  ;;  %s45_s19 = int_to_ptr.vmem [resolvable:$true] %s44_s19 }
  0x25   :  { %p570_p3 = scmp.lt.u32.totalorder %s566_s23, %s724_s3 }
  0x27   :  { %p572_p4 = pnand %p570_p3, %p567_p2 }
  0x29   :  { %575 = shalt.err (!%p572_p4)
}
  0x2a   :  { %s576_s28 = scalar_lea.vmem %s45_s19, 4096  ;;  %p581_p6 = scmp.lt.s32.totalorder %s45_s19, %s45_s19 }
  0x2b   :  { %p577_p5 = scmp.ne.s32.totalorder %s45_s19, %s576_s28  ;;  %p582_p7 = scmp.lt.s32.totalorder %s576_s28, %s576_s28 }
  0x2d   :  { %p583_p8 = por %p582_p7, %p581_p6 }
  0x2f   :  { %p584_p9 = pnand %p583_p8, %p577_p5 }
  0x31   :  { %587 = shalt.err (!%p584_p9)
}
  0x32   :  { %s621_s0 = smov 128   ;;  %s622_s21 = smov 8  }
  0x33   :  { %50 = dma.hbm_to_vmem [thread:$0]  %s724_s3, 4096, %s45_s19, [#allocation6], %s621_s0, %s621_s0, %s622_s21  }
  0x34   :  { %610 = dma.done.wait [#allocation3], 512  }
  0x35   :  { %611 = vsyncadd [#allocation3], 4294966784 }
  0x36   :  { %612 = dma.done.wait [#allocation6], 12288  }
  0x37   :  { %613 = vsyncadd [#allocation6], 4294955008  ;;  %v67_v0 = vld [vmem:[#allocation5 + $0x8] sm:$0xff]  ;;  %v69_v1 = vld [vmem:[#allocation5 + $0x18] sm:$0xff]  ;;  %s623_s8 = smov [#allocation8]  }
  0x38   :  { %v66_v2 = vld [vmem:[#allocation5] sm:$0xff]  ;;  %v410_v3 = vpack.c.bf16 %v69_v1, %v67_v0  ;;  %v68_v4 = vld [vmem:[#allocation5 + $0x10] sm:$0xff]  ;;  %v71_v5 = vld [vmem:[#allocation5 + $0x28] sm:$0xff] }
  0x39   :  { %v73_v6 = vld [vmem:[#allocation5 + $0x38] sm:$0xff]  ;;  %v412_v7 = vpack.c.bf16 %v68_v4, %v66_v2  ;;  %v70_v9 = vld [vmem:[#allocation5 + $0x20] sm:$0xff]  ;;  %v72_v10 = vld [vmem:[#allocation5 + $0x30] sm:$0xff] }
  0x3a   :  { %v414_v8 = vpack.c.bf16 %v73_v6, %v71_v5  ;;  %v75_v11 = vld [vmem:[#allocation5 + $0x48] sm:$0xff]  ;;  %411 = vmatprep.subr.bf16.mxu0 %v410_v3  ;;  %v77_v12 = vld [vmem:[#allocation5 + $0x58] sm:$0xff]  ;;  %v416_v13 = vpack.c.bf16 %v72_v10, %v70_v9  ;;  %v74_v15 = vld [vmem:[#allocation5 + $0x40] sm:$0xff] }
  0x3b   :  { %413 = vmatpush1.bf16.msra.mxu0 %v412_v7  ;;  %v418_v14 = vpack.c.bf16 %v77_v12, %v75_v11  ;;  %v76_v16 = vld [vmem:[#allocation5 + $0x50] sm:$0xff]  ;;  %v79_v17 = vld [vmem:[#allocation5 + $0x68] sm:$0xff]  ;;  %v81_v18 = vld [vmem:[#allocation5 + $0x78] sm:$0xff] }
  0x3c   :  { %415 = vmatprep.subr.bf16.mxu0 %v414_v8  ;;  %v420_v19 = vpack.c.bf16 %v76_v16, %v74_v15  ;;  %v422_v20 = vpack.c.bf16 %v81_v18, %v79_v17  ;;  %v78_v21 = vld [vmem:[#allocation5 + $0x60] sm:$0xff]  ;;  %v80_v22 = vld [vmem:[#allocation5 + $0x70] sm:$0xff]  ;;  %v83_v23 = vld [vmem:[#allocation5 + $0x88] sm:$0xff] }
  0x3d   :  { %v85_v24 = vld [vmem:[#allocation5 + $0x98] sm:$0xff]  ;;  %v424_v25 = vpack.c.bf16 %v80_v22, %v78_v21  ;;  %v82_v27 = vld [vmem:[#allocation5 + $0x80] sm:$0xff]  ;;  %v84_v28 = vld [vmem:[#allocation5 + $0x90] sm:$0xff] }
  0x3e   :  { %v426_v26 = vpack.c.bf16 %v85_v24, %v83_v23  ;;  %v87_v29 = vld [vmem:[#allocation5 + $0xa8] sm:$0xff]  ;;  %v89_v30 = vld [vmem:[#allocation5 + $0xb8] sm:$0xff]  ;;  %v428_v31 = vpack.c.bf16 %v84_v28, %v82_v27  ;;  %v86_v33 = vld [vmem:[#allocation5 + $0xa0] sm:$0xff] }
  0x3f   :  { %417 = vmatpush1.bf16.msra.mxu0 %v416_v13  ;;  %v430_v32 = vpack.c.bf16 %v89_v30, %v87_v29  ;;  %v88_v34 = vld [vmem:[#allocation5 + $0xb0] sm:$0xff]  ;;  %v91_v35 = vld [vmem:[#allocation5 + $0xc8] sm:$0xff]  ;;  %v93_v36 = vld [vmem:[#allocation5 + $0xd8] sm:$0xff] }
  0x40   :  { %419 = vmatprep.subr.bf16.mxu0 %v418_v14  ;;  %v432_v37 = vpack.c.bf16 %v88_v34, %v86_v33  ;;  %v434_v38 = vpack.c.bf16 %v93_v36, %v91_v35  ;;  %v90_v39 = vld [vmem:[#allocation5 + $0xc0] sm:$0xff]  ;;  %v92_v40 = vld [vmem:[#allocation5 + $0xd0] sm:$0xff]  ;;  %v63_v41 = vld [vmem:[#allocation2 + $0x8] sm:$0xff] }
  0x41   :  { %v95_v42 = vld [vmem:[#allocation5 + $0xe8] sm:$0xff]  ;;  %v97_v43 = vld [vmem:[#allocation5 + $0xf8] sm:$0xff]  ;;  %206 = vmatprep.mubr.f32.mxu0 %v63_v41  ;;  %v239_v44 = vld [vmem:[#allocation7 + $0x80] sm:$0xff]  ;;  %v436_v50 = vpack.c.bf16 %v92_v40, %v90_v39 }
  0x42   :  { %v94_v45 = vld [vmem:[#allocation5 + $0xe0] sm:$0xff]  ;;  %v96_v46 = vld [vmem:[#allocation5 + $0xf0] sm:$0xff]  ;;  %v240_v47 = vld [vmem:[#allocation7 + $0x88] sm:$0xff]  ;;  %v438_v56 = vpack.c.bf16 %v97_v43, %v95_v42 }
  0x43   :  { %421 = vmatpush1.bf16.msra.mxu0 %v420_v19  ;;  %v223_v48 = vld [vmem:[#allocation7] sm:$0xff]  ;;  %v224_v49 = vld [vmem:[#allocation7 + $0x8] sm:$0xff]  ;;  %v474_v51 = vpack.c.bf16 %v240_v47, %v239_v44  ;;  %v241_v53 = vld [vmem:[#allocation7 + $0x90] sm:$0xff]  ;;  %v440_v0 = vpack.c.bf16 %v96_v46, %v94_v45 }
  0x44   :  { %423 = vmatprep.subr.bf16.mxu0 %v422_v20  ;;  %v476_v52 = vpack.c.bf16 %v224_v49, %v223_v48  ;;  %v242_v54 = vld [vmem:[#allocation7 + $0x98] sm:$0xff]  ;;  %v225_v55 = vld [vmem:[#allocation7 + $0x10] sm:$0xff]  ;;  %v243_v59 = vld [vmem:[#allocation7 + $0xa0] sm:$0xff] }
  0x45   :  { %v478_v57 = vpack.c.bf16 %v242_v54, %v241_v53  ;;  %v226_v58 = vld [vmem:[#allocation7 + $0x18] sm:$0xff]  ;;  %v244_v60 = vld [vmem:[#allocation7 + $0xa8] sm:$0xff]  ;;  %475 = vmatprep.subr.bf16.mxu1 %v474_v51  ;;  %v98_v1 = vld [vmem:[#allocation5 + $0x100] sm:$0xff] }
  0x46   :  { %v99_v61 = vld [vmem:[#allocation5 + $0x108] sm:$0xff]  ;;  %v101_v62 = vld [vmem:[#allocation5 + $0x118] sm:$0xff]  ;;  %477 = vmatpush3.bf16.msra.mxu1 %v476_v52  ;;  %v480_v63 = vpack.c.bf16 %v226_v58, %v225_v55  ;;  %v482_v2 = vpack.c.bf16 %v244_v60, %v243_v59  ;;  %v227_v3 = vld [vmem:[#allocation7 + $0x20] sm:$0xff] }
  0x47   :  { %425 = vmatpush1.bf16.msra.mxu0 %v424_v25  ;;  %479 = vmatprep.subr.bf16.mxu1 %v478_v57  ;;  %v228_v4 = vld [vmem:[#allocation7 + $0x28] sm:$0xff]  ;;  %v442_v5 = vpack.c.bf16 %v101_v62, %v99_v61  ;;  %v100_v6 = vld [vmem:[#allocation5 + $0x110] sm:$0xff]  ;;  %v246_v8 = vld [vmem:[#allocation7 + $0xb8] sm:$0xff] }
  0x48   :  { %427 = vmatprep.subr.bf16.mxu0 %v426_v26  ;;  %v245_v7 = vld [vmem:[#allocation7 + $0xb0] sm:$0xff]  ;;  %v103_v9 = vld [vmem:[#allocation5 + $0x128] sm:$0xff]  ;;  %v105_v10 = vld [vmem:[#allocation5 + $0x138] sm:$0xff]  ;;  %v484_v11 = vpack.c.bf16 %v228_v4, %v227_v3  ;;  %v444_v12 = vpack.c.bf16 %v100_v6, %v98_v1 }
  0x49   :  { %v102_v13 = vld [vmem:[#allocation5 + $0x120] sm:$0xff]  ;;  %v486_v14 = vpack.c.bf16 %v246_v8, %v245_v7  ;;  %v229_v15 = vld [vmem:[#allocation7 + $0x30] sm:$0xff]  ;;  %v230_v16 = vld [vmem:[#allocation7 + $0x38] sm:$0xff]  ;;  %v446_v17 = vpack.c.bf16 %v105_v10, %v103_v9 }
  0x4a   :  { %481 = vmatpush3.bf16.msra.mxu1 %v480_v63  ;;  %v104_v18 = vld [vmem:[#allocation5 + $0x130] sm:$0xff]  ;;  %v247_v19 = vld [vmem:[#allocation7 + $0xc0] sm:$0xff]  ;;  %v248_v20 = vld [vmem:[#allocation7 + $0xc8] sm:$0xff]  ;;  %v488_v23 = vpack.c.bf16 %v230_v16, %v229_v15 }
  0x4b   :  { %429 = vmatpush1.bf16.msra.mxu0 %v428_v31  ;;  %483 = vmatprep.subr.bf16.mxu1 %v482_v2  ;;  %v107_v21 = vld [vmem:[#allocation5 + $0x148] sm:$0xff]  ;;  %v109_v22 = vld [vmem:[#allocation5 + $0x158] sm:$0xff]  ;;  %v448_v24 = vpack.c.bf16 %v104_v18, %v102_v13  ;;  %v106_v25 = vld [vmem:[#allocation5 + $0x140] sm:$0xff]  ;;  %v490_v26 = vpack.c.bf16 %v248_v20, %v247_v19  ;;  %v132_v20 = vlaneseq }
  0x4c   :  { %431 = vmatprep.subr.bf16.mxu0 %v430_v32  ;;  %v231_v27 = vld [vmem:[#allocation7 + $0x40] sm:$0xff]  ;;  %v232_v28 = vld [vmem:[#allocation7 + $0x48] sm:$0xff]  ;;  %v450_v29 = vpack.c.bf16 %v109_v22, %v107_v21  ;;  %v108_v30 = vld [vmem:[#allocation5 + $0x150] sm:$0xff] }
  0x4d   :  { %v249_v31 = vld [vmem:[#allocation7 + $0xd0] sm:$0xff]  ;;  %v250_v32 = vld [vmem:[#allocation7 + $0xd8] sm:$0xff]  ;;  %v111_v33 = vld [vmem:[#allocation5 + $0x168] sm:$0xff]  ;;  %v492_v35 = vpack.c.bf16 %v232_v28, %v231_v27  ;;  %v452_v36 = vpack.c.bf16 %v108_v30, %v106_v25  ;;  %v133_v21 = vshrl.u32 %v132_v20, 7 }
  0x4e   :  { %485 = vmatpush3.bf16.msra.mxu1 %v484_v11  ;;  %v113_v34 = vld [vmem:[#allocation5 + $0x178] sm:$0xff]  ;;  %v233_v39 = vld [vmem:[#allocation7 + $0x50] sm:$0xff]  ;;  %v251_v43 = vld [vmem:[#allocation7 + $0xe0] sm:$0xff] }
  0x4f   :  { %433 = vmatpush1.bf16.msra.mxu0 %v432_v37  ;;  %487 = vmatprep.subr.bf16.mxu1 %v486_v14  ;;  %v110_v37 = vld [vmem:[#allocation5 + $0x160] sm:$0xff]  ;;  %v234_v40 = vld [vmem:[#allocation7 + $0x58] sm:$0xff]  ;;  %v454_v41 = vpack.c.bf16 %v113_v34, %v111_v33  ;;  %v112_v42 = vld [vmem:[#allocation5 + $0x170] sm:$0xff]  ;;  %v134_v22 = vsub.s32 0, %v133_v21 }
  0x50   :  { %435 = vmatprep.subr.bf16.mxu0 %v434_v38  ;;  %v494_v38 = vpack.c.bf16 %v250_v32, %v249_v31  ;;  %v252_v44 = vld [vmem:[#allocation7 + $0xe8] sm:$0xff]  ;;  %v117_v46 = vld [vmem:[#allocation5 + $0x198] sm:$0xff]  ;;  %v496_v47 = vpack.c.bf16 %v234_v40, %v233_v39  ;;  %v456_v48 = vpack.c.bf16 %v112_v42, %v110_v37  ;;  %v114_v51 = vld [vmem:[#allocation5 + $0x180] sm:$0xff] }
  0x51   :  { %v115_v45 = vld [vmem:[#allocation5 + $0x188] sm:$0xff]  ;;  %v498_v49 = vpack.c.bf16 %v252_v44, %v251_v43  ;;  %v116_v52 = vld [vmem:[#allocation5 + $0x190] sm:$0xff]  ;;  %v121_v54 = vld [vmem:[#allocation5 + $0x1b8] sm:$0xff] }
  0x52   :  { %489 = vmatpush3.bf16.msra.mxu1 %v488_v23  ;;  %v119_v53 = vld [vmem:[#allocation5 + $0x1a8] sm:$0xff]  ;;  %v460_v55 = vpack.c.bf16 %v116_v52, %v114_v51  ;;  %v118_v57 = vld [vmem:[#allocation5 + $0x1a0] sm:$0xff]  ;;  %v120_v58 = vld [vmem:[#allocation5 + $0x1b0] sm:$0xff] }
  0x53   :  { %437 = vmatpush1.bf16.msra.mxu0 %v436_v50  ;;  %491 = vmatprep.subr.bf16.mxu1 %v490_v26  ;;  %v458_v50 = vpack.c.bf16 %v117_v46, %v115_v45  ;;  %v123_v59 = vld [vmem:[#allocation5 + $0x1c8] sm:$0xff]  ;;  %v125_v60 = vld [vmem:[#allocation5 + $0x1d8] sm:$0xff]  ;;  %v464_v61 = vpack.c.bf16 %v120_v58, %v118_v57  ;;  %v122_v63 = vld [vmem:[#allocation5 + $0x1c0] sm:$0xff] }
  0x54   :  { %439 = vmatprep.subr.bf16.mxu0 %v438_v56  ;;  %v462_v56 = vpack.c.bf16 %v121_v54, %v119_v53  ;;  %v466_v62 = vpack.c.bf16 %v125_v60, %v123_v59  ;;  %v127_v1 = vld [vmem:[#allocation5 + $0x1e8] sm:$0xff]  ;;  %v129_v2 = vld [vmem:[#allocation5 + $0x1f8] sm:$0xff]  ;;  %v128_v6 = vld [vmem:[#allocation5 + $0x1f0] sm:$0xff] }
  0x55   :  { %v470_v4 = vpack.c.bf16 %v129_v2, %v127_v1  ;;  %v62_v8 = vld [vmem:[#allocation2] sm:$0xff]  ;;  %v65_v9 = vld [vmem:[#allocation2 + $0x18] sm:$0xff]  ;;  %v64_v10 = vld [vmem:[#allocation2 + $0x10] sm:$0xff] }
  0x56   :  { %493 = vmatpush3.bf16.msra.mxu1 %v492_v35  ;;  %v235_v11 = vld [vmem:[#allocation7 + $0x60] sm:$0xff]  ;;  %v253_v14 = vld [vmem:[#allocation7 + $0xf0] sm:$0xff]  ;;  %v254_v15 = vld [vmem:[#allocation7 + $0xf8] sm:$0xff] }
  0x57   :  { %441 = vmatpush1.bf16.msra.mxu0 %v440_v0  ;;  %495 = vmatprep.subr.bf16.mxu1 %v494_v38  ;;  %v124_v0 = vld [vmem:[#allocation5 + $0x1d0] sm:$0xff]  ;;  %v502_v16 = vpack.c.bf16 %v254_v15, %v253_v14  ;;  %v238_v18 = vld [vmem:[#allocation7 + $0x78] sm:$0xff]  ;;  %v130_v23 = vld [vmem:[%s723_s2] sm:$0x3] }
  0x58   :  { %443 = vmatprep.subr.bf16.mxu0 %v442_v5  ;;  %v468_v3 = vpack.c.bf16 %v124_v0, %v122_v63  ;;  %v126_v5 = vld [vmem:[#allocation5 + $0x1e0] sm:$0xff]  ;;  %v135_v25 = vrot.slane %v130_v23, %v134_v22 }
  0x59   :  { %v472_v7 = vpack.c.bf16 %v128_v6, %v126_v5  ;;  %v369_v40 = vld [vmem:[%s725_s4] ss:$0 sm:$0xff]  ;;  %s356_s4 = sshll.u32 %s623_s8, 4  ;;  %s357_s4 = int_to_ptr.vmem [resolvable:$true] %s356_s4 }
  0x5a   :  { %497 = vmatpush3.bf16.msra.mxu1 %v496_v47  ;;  %s588_s9 = scalar_lea.vmem %s357_s4, 256  ;;  %p593_p11 = scmp.lt.s32.totalorder %s357_s4, %s357_s4 }
  0x5b   :  { %445 = vmatpush1.bf16.msra.mxu0 %v444_v12  ;;  %499 = vmatprep.subr.bf16.mxu1 %v498_v49  ;;  %v236_v12 = vld [vmem:[#allocation7 + $0x68] sm:$0xff]  ;;  %p589_p10 = scmp.ne.s32.totalorder %s357_s4, %s588_s9  ;;  %p594_p12 = scmp.lt.s32.totalorder %s588_s9, %s588_s9 }
  0x5c   :  { %447 = vmatprep.subr.bf16.mxu0 %v446_v17  ;;  %v500_v13 = vpack.c.bf16 %v236_v12, %v235_v11  ;;  %v237_v17 = vld [vmem:[#allocation7 + $0x70] sm:$0xff] }
  0x5d   :  { %v504_v19 = vpack.c.bf16 %v238_v18, %v237_v17  ;;  %p595_p13 = por %p594_p12, %p593_p11 }
  0x5e   :  { %501 = vmatpush3.bf16.msra.mxu1 %v500_v13 }
  0x5f   :  { %449 = vmatpush1.bf16.msra.mxu0 %v448_v24  ;;  %503 = vmatprep.subr.bf16.mxu1 %v502_v16  ;;  %v138_v24 = vsub.s32 1, %v133_v21  ;;  %p596_p0 = pnand %p595_p13, %p589_p10 }
  0x60   :  { %451 = vmatprep.subr.bf16.mxu0 %v450_v29 }
  0x61   :  { %v139_v26 = vrot.slane %v130_v23, %v138_v24 }
  0x62   :  { %505 = vmatpush3.bf16.msra.mxu1 %v504_v19 }
  0x63   :  { %453 = vmatpush1.bf16.msra.mxu0 %v452_v36 }
  0x64   :  { %455 = vmatprep.subr.bf16.mxu0 %v454_v41 }
  0x67   :  { %457 = vmatpush1.bf16.msra.mxu0 %v456_v48 }
  0x68   :  { %459 = vmatprep.subr.bf16.mxu0 %v458_v50 }
  0x6b   :  { %461 = vmatpush1.bf16.msra.mxu0 %v460_v55 }
  0x6c   :  { %463 = vmatprep.subr.bf16.mxu0 %v462_v56 }
  0x6f   :  { %465 = vmatpush1.bf16.msra.mxu0 %v464_v61 }
  0x70   :  { %467 = vmatprep.subr.bf16.mxu0 %v466_v62 }
  0x73   :  { %469 = vmatpush1.bf16.msra.mxu0 %v468_v3 }
  0x74   :  { %471 = vmatprep.subr.bf16.mxu0 %v470_v4 }
  0x77   :  { %473 = vmatpush1.bf16.msra.mxu0 %v472_v7 }
  0x7a   :  { %207 = vmatmul.mubr.f32.vlgmr.msra.gmra.mrb[0].mxu0 %v62_v8 }
  0x7b   :  { %212 = vmatprep.mubr.f32.mxu0 %v65_v9 }
  0x7e   :  { %213 = vmatmul.mubr.f32.gmra.mrb[2].mxu0 %v64_v10 }
 0x14d   :  { %v208_v27 = vpop.f32.mrb[0].mxu0 }
 0x14e   :  { %v209_v28 = vadd.f32 %v208_v27, %v135_v25  ;;  %v210_v29 = vpop.f32.mrb[1].mxu0 }
 0x14f   :  { %v211_v30 = vadd.f32 %v210_v29, %v139_v26 }
 0x150   :  { %v219_v33 = vmax.f32 %v209_v28, 0.0 }
 0x151   :  { %v214_v31 = vpop.f32.mrb[2].mxu0  ;;  %v220_v32 = vmax.f32 %v211_v30, 0.0 }
 0x152   :  { %v215_v34 = vadd.f32 %v214_v31, %v135_v25  ;;  %v216_v35 = vpop.f32.mrb[3].mxu0 }
 0x153   :  { %v217_v36 = vadd.f32 %v216_v35, %v139_v26  ;;  %326 = vmatprep.mubr.f32.mxu1 %v220_v32 }
 0x154   :  { %327 = vmatmul.mubr.f32.vlgmr.msra.gmra.mrb[0].mxu1 %v219_v33  ;;  %v221_v38 = vmax.f32 %v215_v34, 0.0 }
 0x155   :  { %v222_v37 = vmax.f32 %v217_v36, 0.0 }
 0x157   :  { %331 = vmatprep.mubr.f32.mxu1 %v222_v37 }
 0x158   :  { %332 = vmatmul.mubr.f32.gmra.mrb[2].mxu1 %v221_v38 }
 0x227   :  { %v404_v39 = vpop.f32.mrb[0].mxu1 }
 0x228   :  { %v405_v41 = vpop.f32.mrb[1].mxu1 }
 0x229   :  { %v406_v42 = vadd.f32 %v405_v41, %v404_v39 }
 0x22b   :  { %v329_v43 = vadd.f32 %v406_v42, %v369_v40  ;;  %v407_v44 = vpop.f32.mrb[2].mxu1 }
 0x22c   :  { %v408_v45 = vpop.f32.mrb[3].mxu1 }
 0x22d   :  { %v370_v46 = vmul.f32 -1.442695, %v329_v43  ;;  %v409_v47 = vadd.f32 %v408_v45, %v407_v44 }
 0x22f   :  { %514 = vpow2.f32 %v370_v46  ;;  %v334_v48 = vadd.f32 %v409_v47, %v369_v40 }
 0x231   :  { %v371_v49 = vmul.f32 -1.442695, %v334_v48 }
 0x233   :  { %516 = vpow2.f32 %v371_v49 }
 0x239   :  { %v515_v50 = vpop.eup %514 }
 0x23a   :  { %v343_v51 = vadd.f32 1.0, %v515_v50 }
 0x23c   :  { %518 = vrcp.f32 %v343_v51 }
 0x23d   :  { %v517_v52 = vpop.eup %516 }
 0x23e   :  { %v344_v53 = vadd.f32 1.0, %v517_v52 }
 0x240   :  { %520 = vrcp.f32 %v344_v53 }
 0x246   :  { %v519_v54 = vpop.eup %518 }
 0x247   :  { %349 = vst [vmem:[#allocation8] sm:$0xff] %v519_v54 }
 0x24a   :  { %v521_v55 = vpop.eup %520 }
 0x24b   :  { %350 = vst [vmem:[#allocation8 + $0x8] sm:$0xff] %v521_v55 }
 0x24c   :  { %599 = shalt.err (!%p596_p0)
}
 0x24d   :  { %s600_s12 = scalar_lea.hbm %s726_s5, 256 }
 0x24e   :  { %p601_p1 = scmp.ne.s32.totalorder %s726_s5, %s600_s12  ;;  %p604_p2 = scmp.lt.u32.totalorder %s600_s12, %s726_s5 }
 0x250   :  { %p606_p3 = pnand %p604_p2, %p601_p1 }
 0x252   :  { %609 = shalt.err (!%p606_p3)
}
 0x253   :  { %362 = dma.vmem_to_hbm [thread:$0]  %s357_s4, 256, %s726_s5, [#allocation4], %s621_s0, %s621_s0, %s622_s21  }
 0x254   :  { %614 = dma.done.wait [#allocation4], 256  }
 0x255   :  { %615 = vsyncadd [#allocation4], 4294967040 }
 0x256   :  { %366 = vsyncpa [#allocation3], 1 }
 0x257   :  { %367 = vsyncpa [#allocation6], 1 }
 0x258   :  { %368 = vsyncpa [#allocation4], 1 }

</bundles_post_ra>
